<compile_context>
chip_gen: v7x
topology: tpu7x:2x2x1
jax: 0.10.0
libtpu: 0.0.40
codegen_flags: <defaults>
</compile_context>

<pallas_src>
import functools

import jax
import jax.numpy as jnp
from jax.experimental import pallas as pl
from jax.experimental.pallas import tpu as pltpu


def _round_up(x, m):
    return ((x + m - 1) // m) * m


def _choose_batch_tile(B):
    """Pick a batch (M) tile: large rows for MXU fill, >=2 steps for big B."""
    if B >= 4096:
        return 512
    if B >= 512:
        return 256
    # Tiny batch: a single tile rounded up to the sublane multiple (8).
    return _round_up(max(B, 8), 8)


def _encdec_kernel(x_ref, enc_w_ref, enc_b_ref, dec_w_ref, dec_b_ref,
                   bn_ref, out_ref, *, num_blocks):
    """Full encoder/decoder chain for one batch tile.

    x_ref:     (TB, Dp)      bf16 input tile (feature-padded)
    enc_w_ref: (NB, Dp, Dp)  bf16 encoder weights, (in, out) layout
    enc_b_ref: (NB, 1, Dp)   f32 encoder biases
    dec_w_ref: (NB, Dp, Dp)  bf16 decoder weights, (in, out) layout
    dec_b_ref: (NB, 1, Dp)   f32 decoder biases
    bn_ref:    (TB, Dp)      f32 bottleneck output tile
    out_ref:   (TB, Dp)      f32 decoder output tile
    """
    h16 = x_ref[...]                                   # bf16 activations for MXU
    acc = None                                         # f32 running activations

    # Encoder chain (static unroll; num_blocks is small & known at trace time).
    for i in range(num_blocks):
        acc = jnp.dot(h16, enc_w_ref[i],
                      preferred_element_type=jnp.float32) + enc_b_ref[i]
        h16 = acc.astype(jnp.bfloat16)
    bn_ref[...] = acc.astype(bn_ref.dtype)

    # Decoder chain starting from the bottleneck.
    out = acc
    for i in range(num_blocks):
        out = jnp.dot(h16, dec_w_ref[i],
                      preferred_element_type=jnp.float32) + dec_b_ref[i]
        h16 = out.astype(jnp.bfloat16)
    out_ref[...] = out.astype(out_ref.dtype)


def classical_encoder_decoder(x, enc_w, enc_b, dec_w, dec_b, *, batch_tile=None):
    """Pallas wrapper.

    x: (B, D); enc_w/dec_w: (NB, D, D) in (in, out) layout; enc_b/dec_b: (NB, D).
    Returns (bottleneck, output), both (B, D) float32.
    """
    B, D = x.shape
    NB = enc_w.shape[0]
    assert NB >= 1
    assert enc_w.shape == (NB, D, D) and dec_w.shape == (NB, D, D)
    assert enc_b.shape == (NB, D) and dec_b.shape == (NB, D)

    # Lane-dense feature axis.
    Dp = _round_up(D, 128)

    # Batch tiling (the only MXU-utilization lever at small D).
    if batch_tile is None:
        batch_tile = _choose_batch_tile(B)
    assert batch_tile % 8 == 0, "batch tile must be a sublane multiple"
    Bp = _round_up(max(B, batch_tile), batch_tile)

    # Zero-pad + cast operands.  Padded weight rows/cols and bias lanes are
    # zero, so padded feature lanes stay exactly zero through the whole chain.
    xp = jnp.zeros((Bp, Dp), jnp.bfloat16).at[:B, :D].set(x.astype(jnp.bfloat16))

    def pad_w(w):
        return (jnp.zeros((NB, Dp, Dp), jnp.bfloat16)
                .at[:, :D, :D].set(w.astype(jnp.bfloat16)))

    def pad_b(b):
        return (jnp.zeros((NB, 1, Dp), jnp.float32)
                .at[:, 0, :D].set(b.astype(jnp.float32)))

    enc_wp, dec_wp = pad_w(enc_w), pad_w(dec_w)
    enc_bp, dec_bp = pad_b(enc_b), pad_b(dec_b)

    kernel = functools.partial(_encdec_kernel, num_blocks=NB)
    grid = (Bp // batch_tile,)

    bn_p, out_p = pl.pallas_call(
        kernel,
        out_shape=(
            jax.ShapeDtypeStruct((Bp, Dp), jnp.float32),  # bottleneck (padded)
            jax.ShapeDtypeStruct((Bp, Dp), jnp.float32),  # output (padded)
        ),
        grid=grid,
        in_specs=[
            pl.BlockSpec((batch_tile, Dp), lambda i: (i, 0)),   # x tile
            # Grid-invariant weight/bias stacks: constant index maps -> single
            # DMA, revisited on every step (no per-step re-copy).
            pl.BlockSpec((NB, Dp, Dp), lambda i: (0, 0, 0)),    # enc_w (full)
            pl.BlockSpec((NB, 1, Dp), lambda i: (0, 0, 0)),     # enc_b (full)
            pl.BlockSpec((NB, Dp, Dp), lambda i: (0, 0, 0)),    # dec_w (full)
            pl.BlockSpec((NB, 1, Dp), lambda i: (0, 0, 0)),     # dec_b (full)
        ],
        out_specs=(
            pl.BlockSpec((batch_tile, Dp), lambda i: (i, 0)),   # bottleneck
            pl.BlockSpec((batch_tile, Dp), lambda i: (i, 0)),   # output
        ),
        compiler_params=pltpu.CompilerParams(
            dimension_semantics=("parallel",),
            vmem_limit_bytes=64 * 1024 * 1024,
        ),
    )(xp, enc_wp, enc_bp, dec_wp, dec_bp)

    # Strip batch / feature padding.
    return bn_p[:B, :D], out_p[:B, :D]


def _init_linear_params(key, num_blocks, d):
    """Deterministic init mimicking nn.Linear (uniform +/- 1/sqrt(fan_in)).

    Returns weights already transposed to (in, out) layout, shape (NB, D, D),
    and biases of shape (NB, D).
    """
    bound = 1.0 / jnp.sqrt(jnp.float32(d))
    kw, kb = jax.random.split(key)
    w = jax.random.uniform(kw, (num_blocks, d, d), jnp.float32, -bound, bound)
    b = jax.random.uniform(kb, (num_blocks, d), jnp.float32, -bound, bound)
    return w, b


def _reference(x, enc_w, enc_b, dec_w, dec_b, *, quantize=False):
    """Plain-JAX reference of the PyTorch forward.

    With quantize=True, mimics the kernel's bf16 operand casts (f32 accumulate)
    so the comparison is tight; with quantize=False it is the exact f32 math.
    """
    def q(a):
        return a.astype(jnp.bfloat16).astype(jnp.float32) if quantize else a

    h = x
    for i in range(enc_w.shape[0]):
        h = q(h) @ q(enc_w[i]) + enc_b[i]
    bn = h
    o = bn
    for i in range(dec_w.shape[0]):
        o = q(o) @ q(dec_w[i]) + dec_b[i]
    return bn, o


if __name__ == "__main__":
    # Small shapes: batch=8 state vectors, num_dimensions=32, num_blocks=2.
    B, D, NB = 8, 32, 2   # include_time_step=False -> decoder keeps D features

    key = jax.random.PRNGKey(0)
    kx, kenc, kdec = jax.random.split(key, 3)

    x = jax.random.normal(kx, (B, D), dtype=jnp.float32)
    enc_w, enc_b = _init_linear_params(kenc, NB, D)
    dec_w, dec_b = _init_linear_params(kdec, NB, D)

    bn, out = classical_encoder_decoder(x, enc_w, enc_b, dec_w, dec_b)
    jax.block_until_ready((bn, out))

    # Tight check vs. a bf16-operand / f32-accumulate reference (matches the
    # kernel's MXU math up to accumulation order).
    bn_q, out_q = _reference(x, enc_w, enc_b, dec_w, dec_b, quantize=True)
    assert jnp.allclose(bn, bn_q, atol=1e-4, rtol=1e-4)
    assert jnp.allclose(out, out_q, atol=1e-4, rtol=1e-4)

    # Loose check vs. the pure f32 reference (bounds bf16 operand rounding).
    bn_f, out_f = _reference(x, enc_w, enc_b, dec_w, dec_b, quantize=False)
    assert jnp.allclose(bn, bn_f, atol=5e-2, rtol=5e-2)
    assert jnp.allclose(out, out_f, atol=5e-2, rtol=5e-2)

    # Exercise a multi-step ("parallel") grid: batch 16 split into 8-row tiles.
    B2 = 16
    x2 = jax.random.normal(jax.random.PRNGKey(1), (B2, D), dtype=jnp.float32)
    bn2, out2 = classical_encoder_decoder(x2, enc_w, enc_b, dec_w, dec_b,
                                          batch_tile=8)
    jax.block_until_ready((bn2, out2))
    bn2_q, out2_q = _reference(x2, enc_w, enc_b, dec_w, dec_b, quantize=True)
    assert jnp.allclose(bn2, bn2_q, atol=1e-4, rtol=1e-4)
    assert jnp.allclose(out2, out2_q, atol=1e-4, rtol=1e-4)

    print("KERNEL_OK")
</pallas_src>

<mosaic_0001>
module attributes {stable_mosaic.version = 11 : i64} {
  func.func @_encdec_kernel(%arg0: i32, %arg1: memref<8x128xbf16, #tpu.memory_space<vmem>>, %arg2: memref<2x128x128xbf16, #tpu.memory_space<vmem>>, %arg3: memref<2x1x128xf32, #tpu.memory_space<vmem>>, %arg4: memref<2x128x128xbf16, #tpu.memory_space<vmem>>, %arg5: memref<2x1x128xf32, #tpu.memory_space<vmem>>, %arg6: memref<8x128xf32, #tpu.memory_space<vmem>>, %arg7: memref<8x128xf32, #tpu.memory_space<vmem>>) attributes {dimension_semantics = [#tpu.dimension_semantics<parallel>], iteration_bounds = array<i64: 1>, scalar_prefetch = 0 : i64, scratch_operands = 0 : i64, tpu.core_type = #tpu.core_type<tc>, window_params = [{transform_indices = @transform_0, window_bounds = array<i64: 8, 128>}, {pipeline_mode = #tpu.pipeline_mode<synchronous>, transform_indices = @transform_1, window_bounds = array<i64: 2, 128, 128>}, {pipeline_mode = #tpu.pipeline_mode<synchronous>, transform_indices = @transform_2, window_bounds = array<i64: 2, 1, 128>}, {pipeline_mode = #tpu.pipeline_mode<synchronous>, transform_indices = @transform_3, window_bounds = array<i64: 2, 128, 128>}, {pipeline_mode = #tpu.pipeline_mode<synchronous>, transform_indices = @transform_4, window_bounds = array<i64: 2, 1, 128>}, {transform_indices = @transform_5, window_bounds = array<i64: 8, 128>}, {transform_indices = @transform_6, window_bounds = array<i64: 8, 128>}]} {
    %c0 = arith.constant 0 : index
    %c0_0 = arith.constant 0 : index
    %0 = vector.load %arg1[%c0, %c0_0] : memref<8x128xbf16, #tpu.memory_space<vmem>>, vector<8x128xbf16>
    %c0_1 = arith.constant 0 : index
    %c0_2 = arith.constant 0 : index
    %c0_3 = arith.constant 0 : index
    %1 = vector.load %arg2[%c0_1, %c0_2, %c0_3] : memref<2x128x128xbf16, #tpu.memory_space<vmem>>, vector<1x128x128xbf16>
    %2 = vector.shape_cast %1 : vector<1x128x128xbf16> to vector<128x128xbf16>
    %cst = arith.constant dense<0.000000e+00> : vector<8x128xf32>
    %3 = tpu.matmul %0, %2, %cst {dimension_numbers = #tpu.dot_dimension_numbers<[1], [0], [0], [1], [0, 0, 1, 1], [], []>} : vector<8x128xbf16>, vector<128x128xbf16>, vector<8x128xf32> -> vector<8x128xf32>
    %c0_4 = arith.constant 0 : index
    %c0_5 = arith.constant 0 : index
    %c0_6 = arith.constant 0 : index
    %4 = vector.load %arg3[%c0_4, %c0_5, %c0_6] : memref<2x1x128xf32, #tpu.memory_space<vmem>>, vector<1x1x128xf32>
    %5 = vector.shape_cast %4 : vector<1x1x128xf32> to vector<1x128xf32>
    %6 = vector.broadcast %5 : vector<1x128xf32> to vector<8x128xf32>
    %7 = arith.addf %3, %6 : vector<8x128xf32>
    %8 = arith.truncf %7 : vector<8x128xf32> to vector<8x128xbf16>
    %c1 = arith.constant 1 : index
    %c0_7 = arith.constant 0 : index
    %c0_8 = arith.constant 0 : index
    %9 = vector.load %arg2[%c1, %c0_7, %c0_8] : memref<2x128x128xbf16, #tpu.memory_space<vmem>>, vector<1x128x128xbf16>
    %10 = vector.shape_cast %9 : vector<1x128x128xbf16> to vector<128x128xbf16>
    %cst_9 = arith.constant dense<0.000000e+00> : vector<8x128xf32>
    %11 = tpu.matmul %8, %10, %cst_9 {dimension_numbers = #tpu.dot_dimension_numbers<[1], [0], [0], [1], [0, 0, 1, 1], [], []>} : vector<8x128xbf16>, vector<128x128xbf16>, vector<8x128xf32> -> vector<8x128xf32>
    %c1_10 = arith.constant 1 : index
    %c0_11 = arith.constant 0 : index
    %c0_12 = arith.constant 0 : index
    %12 = vector.load %arg3[%c1_10, %c0_11, %c0_12] : memref<2x1x128xf32, #tpu.memory_space<vmem>>, vector<1x1x128xf32>
    %13 = vector.shape_cast %12 : vector<1x1x128xf32> to vector<1x128xf32>
    %14 = vector.broadcast %13 : vector<1x128xf32> to vector<8x128xf32>
    %15 = arith.addf %11, %14 : vector<8x128xf32>
    %16 = arith.truncf %15 : vector<8x128xf32> to vector<8x128xbf16>
    %c0_13 = arith.constant 0 : index
    %c0_14 = arith.constant 0 : index
    %17 = vector.load %arg6[%c0_13, %c0_14] : memref<8x128xf32, #tpu.memory_space<vmem>>, vector<8x128xf32>
    tpu.vector_store %arg6[%c0_13, %c0_14], %15 {strides = array<i32>} : memref<8x128xf32, #tpu.memory_space<vmem>>, vector<8x128xf32>,
    %c0_15 = arith.constant 0 : index
    %c0_16 = arith.constant 0 : index
    %c0_17 = arith.constant 0 : index
    %18 = vector.load %arg4[%c0_15, %c0_16, %c0_17] : memref<2x128x128xbf16, #tpu.memory_space<vmem>>, vector<1x128x128xbf16>
    %19 = vector.shape_cast %18 : vector<1x128x128xbf16> to vector<128x128xbf16>
    %cst_18 = arith.constant dense<0.000000e+00> : vector<8x128xf32>
    %20 = tpu.matmul %16, %19, %cst_18 {dimension_numbers = #tpu.dot_dimension_numbers<[1], [0], [0], [1], [0, 0, 1, 1], [], []>} : vector<8x128xbf16>, vector<128x128xbf16>, vector<8x128xf32> -> vector<8x128xf32>
    %c0_19 = arith.constant 0 : index
    %c0_20 = arith.constant 0 : index
    %c0_21 = arith.constant 0 : index
    %21 = vector.load %arg5[%c0_19, %c0_20, %c0_21] : memref<2x1x128xf32, #tpu.memory_space<vmem>>, vector<1x1x128xf32>
    %22 = vector.shape_cast %21 : vector<1x1x128xf32> to vector<1x128xf32>
    %23 = vector.broadcast %22 : vector<1x128xf32> to vector<8x128xf32>
    %24 = arith.addf %20, %23 : vector<8x128xf32>
    %25 = arith.truncf %24 : vector<8x128xf32> to vector<8x128xbf16>
    %c1_22 = arith.constant 1 : index
    %c0_23 = arith.constant 0 : index
    %c0_24 = arith.constant 0 : index
    %26 = vector.load %arg4[%c1_22, %c0_23, %c0_24] : memref<2x128x128xbf16, #tpu.memory_space<vmem>>, vector<1x128x128xbf16>
    %27 = vector.shape_cast %26 : vector<1x128x128xbf16> to vector<128x128xbf16>
    %cst_25 = arith.constant dense<0.000000e+00> : vector<8x128xf32>
    %28 = tpu.matmul %25, %27, %cst_25 {dimension_numbers = #tpu.dot_dimension_numbers<[1], [0], [0], [1], [0, 0, 1, 1], [], []>} : vector<8x128xbf16>, vector<128x128xbf16>, vector<8x128xf32> -> vector<8x128xf32>
    %c1_26 = arith.constant 1 : index
    %c0_27 = arith.constant 0 : index
    %c0_28 = arith.constant 0 : index
    %29 = vector.load %arg5[%c1_26, %c0_27, %c0_28] : memref<2x1x128xf32, #tpu.memory_space<vmem>>, vector<1x1x128xf32>
    %30 = vector.shape_cast %29 : vector<1x1x128xf32> to vector<1x128xf32>
    %31 = vector.broadcast %30 : vector<1x128xf32> to vector<8x128xf32>
    %32 = arith.addf %28, %31 : vector<8x128xf32>
    %c0_29 = arith.constant 0 : index
    %c0_30 = arith.constant 0 : index
    %33 = vector.load %arg7[%c0_29, %c0_30] : memref<8x128xf32, #tpu.memory_space<vmem>>, vector<8x128xf32>
    tpu.vector_store %arg7[%c0_29, %c0_30], %32 {strides = array<i32>} : memref<8x128xf32, #tpu.memory_space<vmem>>, vector<8x128xf32>,
    return
  }
  func.func @transform_0(%arg0: i32) -> (i32, i32) {
    %c0_i32 = arith.constant 0 : i32
    %c0_i32_0 = arith.constant 0 : i32
    return %arg0, %c0_i32 : i32, i32
  }
  func.func @transform_1(%arg0: i32) -> (i32, i32, i32) {
    %c0_i32 = arith.constant 0 : i32
    %c0_i32_0 = arith.constant 0 : i32
    %c0_i32_1 = arith.constant 0 : i32
    %c0_i32_2 = arith.constant 0 : i32
    return %c0_i32, %c0_i32_0, %c0_i32_1 : i32, i32, i32
  }
  func.func @transform_2(%arg0: i32) -> (i32, i32, i32) {
    %c0_i32 = arith.constant 0 : i32
    %c0_i32_0 = arith.constant 0 : i32
    %c0_i32_1 = arith.constant 0 : i32
    %c0_i32_2 = arith.constant 0 : i32
    return %c0_i32, %c0_i32_0, %c0_i32_1 : i32, i32, i32
  }
  func.func @transform_3(%arg0: i32) -> (i32, i32, i32) {
    %c0_i32 = arith.constant 0 : i32
    %c0_i32_0 = arith.constant 0 : i32
    %c0_i32_1 = arith.constant 0 : i32
    %c0_i32_2 = arith.constant 0 : i32
    return %c0_i32, %c0_i32_0, %c0_i32_1 : i32, i32, i32
  }
  func.func @transform_4(%arg0: i32) -> (i32, i32, i32) {
    %c0_i32 = arith.constant 0 : i32
    %c0_i32_0 = arith.constant 0 : i32
    %c0_i32_1 = arith.constant 0 : i32
    %c0_i32_2 = arith.constant 0 : i32
    return %c0_i32, %c0_i32_0, %c0_i32_1 : i32, i32, i32
  }
  func.func @transform_5(%arg0: i32) -> (i32, i32) {
    %c0_i32 = arith.constant 0 : i32
    %c0_i32_0 = arith.constant 0 : i32
    return %arg0, %c0_i32 : i32, i32
  }
  func.func @transform_6(%arg0: i32) -> (i32, i32) {
    %c0_i32 = arith.constant 0 : i32
    %c0_i32_0 = arith.constant 0 : i32
    return %arg0, %c0_i32 : i32, i32
  }
}

</mosaic_0001>

<bundles_post_ra>
// kernel: tpu_custom_call.1
= control target key start
LH: loop header
LB: loop body
LE: loop exit
PB: predicated region body
PF: predicated region fallthrough
CT: control target
= control target key end

     0   :  { %12 = vsyncpa [#allocation3], 0  ;;  %s1109_s0 = inlined_call_operand.hbm [shape: bf16[8,128], index: 0, kind: input, shape index: {}]   ;;  %s1110_s1 = inlined_call_operand.hbm [shape: bf16[2,128,128], index: 1, kind: input, shape index: {}]   ;;  %s1111_s2 = inlined_call_operand.hbm [shape: f32[2,1,128], index: 2, kind: input, shape index: {}]   ;;  %s1112_s3 = inlined_call_operand.hbm [shape: bf16[2,128,128], index: 3, kind: input, shape index: {}]   ;;  %s1113_s4 = inlined_call_operand.hbm [shape: f32[2,1,128], index: 4, kind: input, shape index: {}]   ;;  %s1114_s5 = inlined_call_operand.hbm [shape: f32[8,128], index: 5, kind: output, shape index: {0}]   ;;  %s1115_s6 = inlined_call_operand.hbm [shape: f32[8,128], index: 6, kind: output, shape index: {1}]  }
   0x1   :  { %13 = vsyncpa [#allocation6], 0 }
   0x2   :  { %14 = vsyncpa [#allocation9], 0 }
   0x3   :  { %15 = vsyncpa [#allocation4], 0 }
   0x4   :  { %16 = vsyncpa [#allocation13], 0  ;;  %s937_s21 = smov [#allocation5]   ;;  %s773_s25 = scalar_lea.hbm %s1110_s1, 2048 }
   0x5   :  { %s32_s22 = sshll.u32 %s937_s21, 4  ;;  %p774_p0 = scmp.ne.s32.totalorder %s1110_s1, %s773_s25  ;;  %s33_s22 = int_to_ptr.vmem [resolvable:$true] %s32_s22 }
   0x6   :  { %p777_p1 = scmp.lt.u32.totalorder %s773_s25, %s1110_s1 }
   0x8   :  { %p779_p2 = pnand %p777_p1, %p774_p0 }
   0xa   :  { %782 = shalt.err (!%p779_p2)
}
   0xb   :  { %s783_s30 = scalar_lea.vmem %s33_s22, 2048  ;;  %p788_p4 = scmp.lt.s32.totalorder %s33_s22, %s33_s22 }
   0xc   :  { %p784_p3 = scmp.ne.s32.totalorder %s33_s22, %s783_s30  ;;  %p789_p5 = scmp.lt.s32.totalorder %s783_s30, %s783_s30 }
   0xe   :  { %p790_p6 = por %p789_p5, %p788_p4 }
  0x10   :  { %p791_p7 = pnand %p790_p6, %p784_p3 }
  0x12   :  { %794 = shalt.err (!%p791_p7)
}
  0x13   :  { %s938_s7 = smov 64   ;;  %s939_s8 = smov 4  }
  0x14   :  { %38 = dma.hbm_to_vmem [thread:$0]  %s1110_s1, 2048, %s33_s22, [#allocation6], %s938_s7, %s938_s7, %s939_s8  }
  0x15   :  { %s940_s11 = smov [#allocation8]   ;;  %s941_s13 = smov [#allocation2]  }
  0x16   :  { %s56_s12 = sshll.u32 %s940_s11, 4  ;;  %s23_s14 = sshll.u32 %s941_s13, 4  ;;  %s57_s12 = int_to_ptr.vmem [resolvable:$true] %s56_s12  ;;  %s24_s14 = int_to_ptr.vmem [resolvable:$true] %s23_s14 }
  0x17   :  { %s795_s17 = scalar_lea.hbm %s1112_s3, 2048 }
  0x18   :  { %p796_p8 = scmp.ne.s32.totalorder %s1112_s3, %s795_s17  ;;  %p799_p9 = scmp.lt.u32.totalorder %s795_s17, %s1112_s3 }
  0x1a   :  { %p801_p10 = pnand %p799_p9, %p796_p8 }
  0x1c   :  { %804 = shalt.err (!%p801_p10)
}
  0x1d   :  { %s805_s1 = scalar_lea.vmem %s57_s12, 2048  ;;  %p810_p12 = scmp.lt.s32.totalorder %s57_s12, %s57_s12 }
  0x1e   :  { %p806_p11 = scmp.ne.s32.totalorder %s57_s12, %s805_s1  ;;  %p811_p13 = scmp.lt.s32.totalorder %s805_s1, %s805_s1 }
  0x20   :  { %p812_p0 = por %p811_p13, %p810_p12 }
  0x22   :  { %p813_p1 = pnand %p812_p0, %p806_p11 }
  0x24   :  { %816 = shalt.err (!%p813_p1)
}
  0x25   :  { %62 = dma.hbm_to_vmem [thread:$0]  %s1112_s3, 2048, %s57_s12, [#allocation9], %s938_s7, %s938_s7, %s939_s8  }
  0x26   :  { %s817_s26 = scalar_lea.hbm %s1109_s0, 64 }
  0x27   :  { %p818_p2 = scmp.ne.s32.totalorder %s1109_s0, %s817_s26  ;;  %p821_p3 = scmp.lt.u32.totalorder %s817_s26, %s1109_s0 }
  0x29   :  { %p823_p4 = pnand %p821_p3, %p818_p2 }
  0x2b   :  { %826 = shalt.err (!%p823_p4)
}
  0x2c   :  { %s827_s9 = scalar_lea.vmem %s24_s14, 64  ;;  %p832_p6 = scmp.lt.s32.totalorder %s24_s14, %s24_s14 }
  0x2d   :  { %p828_p5 = scmp.ne.s32.totalorder %s24_s14, %s827_s9  ;;  %p833_p7 = scmp.lt.s32.totalorder %s827_s9, %s827_s9 }
  0x2f   :  { %p834_p8 = por %p833_p7, %p832_p6 }
  0x31   :  { %p835_p9 = pnand %p834_p8, %p828_p5 }
  0x33   :  { %838 = shalt.err (!%p835_p9)
}
  0x34   :  { %26 = dma.hbm_to_vmem [thread:$0]  %s1109_s0, 64, %s24_s14, [#allocation3]  }
  0x35   :  { %s942_s8 = smov [#allocation7]   ;;  %s839_s13 = scalar_lea.hbm %s1111_s2, 32 }
  0x36   :  { %s44_s10 = sshll.u32 %s942_s8, 4  ;;  %p840_p10 = scmp.ne.s32.totalorder %s1111_s2, %s839_s13  ;;  %s45_s10 = int_to_ptr.vmem [resolvable:$true] %s44_s10 }
  0x37   :  { %p843_p11 = scmp.lt.u32.totalorder %s839_s13, %s1111_s2 }
  0x39   :  { %p845_p12 = pnand %p843_p11, %p840_p10 }
  0x3b   :  { %848 = shalt.err (!%p845_p12)
}
  0x3c   :  { %s849_s19 = scalar_lea.vmem %s45_s10, 32  ;;  %p854_p0 = scmp.lt.s32.totalorder %s45_s10, %s45_s10 }
  0x3d   :  { %p850_p13 = scmp.ne.s32.totalorder %s45_s10, %s849_s19  ;;  %p855_p1 = scmp.lt.s32.totalorder %s849_s19, %s849_s19 }
  0x3f   :  { %p856_p2 = por %p855_p1, %p854_p0 }
  0x41   :  { %p857_p3 = pnand %p856_p2, %p850_p13 }
  0x43   :  { %860 = shalt.err (!%p857_p3)
}
  0x44   :  { %s943_s0 = smov 16   ;;  %s944_s14 = smov 1  }
  0x45   :  { %50 = dma.hbm_to_vmem [thread:$0]  %s1111_s2, 32, %s45_s10, [#allocation6], %s943_s0, %s943_s0, %s944_s14  }
  0x46   :  { %s945_s1 = smov [#allocation10]   ;;  %s861_s25 = scalar_lea.hbm %s1113_s4, 32 }
  0x47   :  { %s68_s22 = sshll.u32 %s945_s1, 4  ;;  %p862_p4 = scmp.ne.s32.totalorder %s1113_s4, %s861_s25  ;;  %s69_s22 = int_to_ptr.vmem [resolvable:$true] %s68_s22 }
  0x48   :  { %p865_p5 = scmp.lt.u32.totalorder %s861_s25, %s1113_s4 }
  0x4a   :  { %p867_p6 = pnand %p865_p5, %p862_p4 }
  0x4c   :  { %870 = shalt.err (!%p867_p6)
}
  0x4d   :  { %s871_s30 = scalar_lea.vmem %s69_s22, 32  ;;  %p876_p8 = scmp.lt.s32.totalorder %s69_s22, %s69_s22 }
  0x4e   :  { %p872_p7 = scmp.ne.s32.totalorder %s69_s22, %s871_s30  ;;  %p877_p9 = scmp.lt.s32.totalorder %s871_s30, %s871_s30 }
  0x50   :  { %p878_p10 = por %p877_p9, %p876_p8 }
  0x52   :  { %p879_p11 = pnand %p878_p10, %p872_p7 }
  0x54   :  { %882 = shalt.err (!%p879_p11)
}
  0x55   :  { %74 = dma.hbm_to_vmem [thread:$0]  %s1113_s4, 32, %s69_s22, [#allocation9], %s943_s0, %s943_s0, %s944_s14  }
  0x56   :  { %927 = dma.done.wait [#allocation3], 64  }
  0x57   :  { %928 = vsyncadd [#allocation3], 4294967232 }
  0x58   :  { %929 = dma.done.wait [#allocation6], 2080  }
  0x59   :  { %930 = vsyncadd [#allocation6], 4294965216 }
  0x5a   :  { %931 = dma.done.wait [#allocation9], 2080  }
  0x5b   :  { %932 = vsyncadd [#allocation9], 4294965216  ;;  %v946_v0 = vmov 0.0   ;;  %vm947_vm0 = vmmov 0   ;;  %v741_v1 = vld [vmem:[#allocation5] sm:$0xff]   ;;  %v742_v2 = vld [vmem:[#allocation5 + $0x8] sm:$0xff]  }
  0x5c   :  { %648 = vmatprep.subr.bf16.mxu0 %v946_v0  ;;  %664 = vmatprep.mubr.msk.bf16.mxu0 %vm947_vm0, %v946_v0  ;;  %v743_v3 = vld [vmem:[#allocation5 + $0x10] sm:$0xff]   ;;  %v749_v4 = vld [vmem:[#allocation5 + $0x40] sm:$0xff]   ;;  %v744_v5 = vld [vmem:[#allocation5 + $0x18] sm:$0xff]   ;;  %s948_s4 = smov [#allocation11]  }
  0x5d   :  { %668 = vmatprep.subr.bf16.mxu1 %v946_v0  ;;  %684 = vmatprep.mubr.msk.bf16.mxu1 %vm947_vm0, %v946_v0  ;;  %v750_v6 = vld [vmem:[#allocation5 + $0x48] sm:$0xff]   ;;  %v745_v7 = vld [vmem:[#allocation5 + $0x20] sm:$0xff]   ;;  %v751_v8 = vld [vmem:[#allocation5 + $0x50] sm:$0xff]   ;;  %s551_s3 = sshll.u32 %s948_s4, 4  ;;  %s552_s3 = int_to_ptr.vmem [resolvable:$true] %s551_s3 }
  0x5e   :  { %649 = vmatpush3.bf16.msra.mxu0 %v741_v1  ;;  %669 = vmatpush3.bf16.msra.mxu1 %v749_v4  ;;  %v746_v9 = vld [vmem:[#allocation5 + $0x28] sm:$0xff]   ;;  %v752_v10 = vld [vmem:[#allocation5 + $0x58] sm:$0xff]   ;;  %v747_v11 = vld [vmem:[#allocation5 + $0x30] sm:$0xff]   ;;  %s883_s7 = scalar_lea.vmem %s552_s3, 128  ;;  %p888_p13 = scmp.lt.s32.totalorder %s552_s3, %s552_s3 }
  0x5f   :  { %650 = vmatprep.subr.bf16.mxu0 %v946_v0  ;;  %670 = vmatprep.subr.bf16.mxu1 %v946_v0  ;;  %v753_v12 = vld [vmem:[#allocation5 + $0x60] sm:$0xff]   ;;  %v748_v13 = vld [vmem:[#allocation5 + $0x38] sm:$0xff]   ;;  %v754_v14 = vld [vmem:[#allocation5 + $0x68] sm:$0xff]   ;;  %p884_p12 = scmp.ne.s32.totalorder %s552_s3, %s883_s7  ;;  %p889_p0 = scmp.lt.s32.totalorder %s883_s7, %s883_s7 }
  0x60   :  { %v91_v15 = vld [vmem:[#allocation2] sm:$0xf]  ;;  %v755_v16 = vld [vmem:[#allocation5 + $0x70] sm:$0xff]   ;;  %v757_v18 = vld [vmem:[#allocation8] sm:$0xff]  }
  0x61   :  { %v756_v17 = vld [vmem:[#allocation5 + $0x78] sm:$0xff]   ;;  %v758_v19 = vld [vmem:[#allocation8 + $0x8] sm:$0xff]   ;;  %v761_v22 = vld [vmem:[#allocation8 + $0x20] sm:$0xff]   ;;  %p890_p1 = por %p889_p0, %p888_p13 }
  0x62   :  { %651 = vmatpush3.bf16.msra.mxu0 %v742_v2  ;;  %671 = vmatpush3.bf16.msra.mxu1 %v750_v6  ;;  %v759_v20 = vld [vmem:[#allocation8 + $0x10] sm:$0xff]   ;;  %v760_v21 = vld [vmem:[#allocation8 + $0x18] sm:$0xff]   ;;  %v762_v23 = vld [vmem:[#allocation8 + $0x28] sm:$0xff]  }
  0x63   :  { %652 = vmatprep.subr.bf16.mxu0 %v946_v0  ;;  %672 = vmatprep.subr.bf16.mxu1 %v946_v0  ;;  %v763_v24 = vld [vmem:[#allocation8 + $0x30] sm:$0xff]   ;;  %v576_v25 = vld [vmem:[#allocation7] ss:$0 sm:$0xff]  ;;  %v765_v33 = vld [vmem:[#allocation8 + $0x40] sm:$0xff]   ;;  %p891_p2 = pnand %p890_p1, %p884_p12 }
  0x64   :  { %v764_v32 = vld [vmem:[#allocation8 + $0x38] sm:$0xff]   ;;  %v766_v34 = vld [vmem:[#allocation8 + $0x48] sm:$0xff]   ;;  %v767_v35 = vld [vmem:[#allocation8 + $0x50] sm:$0xff]  }
  0x65   :  { %v768_v36 = vld [vmem:[#allocation8 + $0x58] sm:$0xff]   ;;  %v769_v37 = vld [vmem:[#allocation8 + $0x60] sm:$0xff]   ;;  %v770_v38 = vld [vmem:[#allocation8 + $0x68] sm:$0xff]  }
  0x66   :  { %653 = vmatpush3.bf16.msra.mxu0 %v743_v3  ;;  %673 = vmatpush3.bf16.msra.mxu1 %v751_v8  ;;  %v771_v39 = vld [vmem:[#allocation8 + $0x70] sm:$0xff]   ;;  %v585_v40 = vld [vmem:[#allocation7 + $0x1] ss:$0 sm:$0xff]  ;;  %v594_v48 = vld [vmem:[#allocation10] ss:$0 sm:$0xff] }
  0x67   :  { %654 = vmatprep.subr.bf16.mxu0 %v946_v0  ;;  %674 = vmatprep.subr.bf16.mxu1 %v946_v0  ;;  %v772_v47 = vld [vmem:[#allocation8 + $0x78] sm:$0xff]  }
  0x6a   :  { %655 = vmatpush3.bf16.msra.mxu0 %v744_v5  ;;  %675 = vmatpush3.bf16.msra.mxu1 %v752_v10 }
  0x6b   :  { %656 = vmatprep.subr.bf16.mxu0 %v946_v0  ;;  %676 = vmatprep.subr.bf16.mxu1 %v946_v0 }
  0x6e   :  { %657 = vmatpush3.bf16.msra.mxu0 %v745_v7  ;;  %677 = vmatpush3.bf16.msra.mxu1 %v753_v12 }
  0x6f   :  { %658 = vmatprep.subr.bf16.mxu0 %v946_v0  ;;  %678 = vmatprep.subr.bf16.mxu1 %v946_v0 }
  0x72   :  { %659 = vmatpush3.bf16.msra.mxu0 %v746_v9  ;;  %679 = vmatpush3.bf16.msra.mxu1 %v754_v14 }
  0x73   :  { %660 = vmatprep.subr.bf16.mxu0 %v946_v0  ;;  %680 = vmatprep.subr.bf16.mxu1 %v946_v0 }
  0x76   :  { %661 = vmatpush3.bf16.msra.mxu0 %v747_v11  ;;  %681 = vmatpush3.bf16.msra.mxu1 %v755_v16 }
  0x77   :  { %662 = vmatprep.subr.bf16.mxu0 %v946_v0  ;;  %682 = vmatprep.subr.bf16.mxu1 %v946_v0 }
  0x7a   :  { %663 = vmatpush3.bf16.msra.mxu0 %v748_v13  ;;  %683 = vmatpush3.bf16.msra.mxu1 %v756_v17 }
  0x7b   :  { %688 = vmatprep.subr.bf16.mxu0 %v946_v0  ;;  %708 = vmatprep.subr.bf16.mxu1 %v946_v0 }
  0x7d   :  { %665 = vmatmul.mubr.bf16.vlgmr.msra.gmra.mrb[0].mxu0 %v91_v15 }
  0x7e   :  { %704 = vmatprep.mubr.msk.bf16.mxu0 %vm947_vm0, %v946_v0  ;;  %689 = vmatpush3.bf16.msra.mxu0 %v757_v18 }
  0x7f   :  { %690 = vmatprep.subr.bf16.mxu0 %v946_v0 }
  0x82   :  { %691 = vmatpush3.bf16.msra.mxu0 %v758_v19 }
  0x83   :  { %692 = vmatprep.subr.bf16.mxu0 %v946_v0 }
  0x86   :  { %693 = vmatpush3.bf16.msra.mxu0 %v759_v20 }
  0x87   :  { %694 = vmatprep.subr.bf16.mxu0 %v946_v0 }
  0x8a   :  { %695 = vmatpush3.bf16.msra.mxu0 %v760_v21 }
  0x8b   :  { %696 = vmatprep.subr.bf16.mxu0 %v946_v0 }
  0x8e   :  { %697 = vmatpush3.bf16.msra.mxu0 %v761_v22 }
  0x8f   :  { %698 = vmatprep.subr.bf16.mxu0 %v946_v0 }
  0x92   :  { %699 = vmatpush3.bf16.msra.mxu0 %v762_v23 }
  0x93   :  { %700 = vmatprep.subr.bf16.mxu0 %v946_v0 }
  0x96   :  { %701 = vmatpush3.bf16.msra.mxu0 %v763_v24 }
  0x97   :  { %702 = vmatprep.subr.bf16.mxu0 %v946_v0 }
  0x9a   :  { %703 = vmatpush3.bf16.msra.mxu0 %v764_v32 }
 0x150   :  { %v197_v26 = vpop.f32.mrb[0].mxu0 }
 0x151   :  { %v198_v27 = vadd.f32 %v576_v25, %v197_v26  ;;  %v666_v28 = vpop.f32.mrb[1].mxu0 }
 0x152   :  { %v200_v29 = vpop.f32.mrb[2].mxu0 }
 0x153   :  { %v203_v30 = vpack.c.bf16 %v198_v27, %v198_v27  ;;  %v667_v31 = vpop.f32.mrb[3].mxu0 }
 0x155   :  { %685 = vmatmul.mubr.bf16.vlgmr.msra.gmra.mrb[0].mxu1 %v203_v30 }
 0x156   :  { %724 = vmatprep.mubr.msk.bf16.mxu1 %vm947_vm0, %v946_v0  ;;  %709 = vmatpush3.bf16.msra.mxu1 %v765_v33 }
 0x157   :  { %710 = vmatprep.subr.bf16.mxu1 %v946_v0 }
 0x15a   :  { %711 = vmatpush3.bf16.msra.mxu1 %v766_v34 }
 0x15b   :  { %712 = vmatprep.subr.bf16.mxu1 %v946_v0 }
 0x15e   :  { %713 = vmatpush3.bf16.msra.mxu1 %v767_v35 }
 0x15f   :  { %714 = vmatprep.subr.bf16.mxu1 %v946_v0 }
 0x162   :  { %715 = vmatpush3.bf16.msra.mxu1 %v768_v36 }
 0x163   :  { %716 = vmatprep.subr.bf16.mxu1 %v946_v0 }
 0x166   :  { %717 = vmatpush3.bf16.msra.mxu1 %v769_v37 }
 0x167   :  { %718 = vmatprep.subr.bf16.mxu1 %v946_v0 }
 0x16a   :  { %719 = vmatpush3.bf16.msra.mxu1 %v770_v38 }
 0x16b   :  { %720 = vmatprep.subr.bf16.mxu1 %v946_v0 }
 0x16e   :  { %721 = vmatpush3.bf16.msra.mxu1 %v771_v39 }
 0x16f   :  { %722 = vmatprep.subr.bf16.mxu1 %v946_v0 }
 0x172   :  { %723 = vmatpush3.bf16.msra.mxu1 %v772_v47 }
 0x228   :  { %v311_v41 = vpop.f32.mrb[0].mxu1 }
 0x229   :  { %v312_v42 = vadd.f32 %v585_v40, %v311_v41  ;;  %v686_v43 = vpop.f32.mrb[1].mxu1 }
 0x22a   :  { %v314_v44 = vpop.f32.mrb[2].mxu1 }
 0x22b   :  { %v317_v45 = vpack.c.bf16 %v312_v42, %v312_v42  ;;  %318 = vst [vmem:[#allocation11] sm:$0xff] %v312_v42  ;;  %v687_v46 = vpop.f32.mrb[3].mxu1 }
 0x22d   :  { %705 = vmatmul.mubr.bf16.vlgmr.msra.gmra.mrb[4].mxu0 %v317_v45 }
 0x300   :  { %v424_v49 = vpop.f32.mrb[4].mxu0 }
 0x301   :  { %v425_v50 = vadd.f32 %v594_v48, %v424_v49  ;;  %v706_v51 = vpop.f32.mrb[5].mxu0 }
 0x302   :  { %v427_v52 = vpop.f32.mrb[6].mxu0 }
 0x303   :  { %v430_v53 = vpack.c.bf16 %v425_v50, %v425_v50  ;;  %v707_v54 = vpop.f32.mrb[7].mxu0 }
 0x305   :  { %725 = vmatmul.mubr.bf16.vlgmr.msra.gmra.mrb[4].mxu1 %v430_v53 }
 0x306   :  { %894 = shalt.err (!%p891_p2)
}
 0x307   :  { %s895_s11 = scalar_lea.hbm %s1114_s5, 128 }
 0x308   :  { %p896_p3 = scmp.ne.s32.totalorder %s1114_s5, %s895_s11  ;;  %p899_p4 = scmp.lt.u32.totalorder %s895_s11, %s1114_s5 }
 0x30a   :  { %p901_p5 = pnand %p899_p4, %p896_p3 }
 0x30c   :  { %904 = shalt.err (!%p901_p5)
}
 0x30d   :  { %554 = dma.vmem_to_hbm [thread:$0]  %s552_s3, 128, %s1114_s5, [#allocation4]   ;;  %v603_v55 = vld [vmem:[#allocation10 + $0x1] ss:$0 sm:$0xff] }
 0x30e   :  { %s949_s19 = smov [#allocation12]  }
 0x30f   :  { %s561_s0 = sshll.u32 %s949_s19, 4  ;;  %s562_s0 = int_to_ptr.vmem [resolvable:$true] %s561_s0 }
 0x310   :  { %s905_s14 = scalar_lea.vmem %s562_s0, 128  ;;  %p910_p7 = scmp.lt.s32.totalorder %s562_s0, %s562_s0 }
 0x311   :  { %p906_p6 = scmp.ne.s32.totalorder %s562_s0, %s905_s14  ;;  %p911_p8 = scmp.lt.s32.totalorder %s905_s14, %s905_s14 }
 0x313   :  { %p912_p9 = por %p911_p8, %p910_p7 }
 0x315   :  { %p913_p10 = pnand %p912_p9, %p906_p6 }
 0x3d8   :  { %v538_v56 = vpop.f32.mrb[4].mxu1 }
 0x3d9   :  { %v539_v57 = vadd.f32 %v603_v55, %v538_v56  ;;  %v726_v58 = vpop.f32.mrb[5].mxu1 }
 0x3da   :  { %v541_v59 = vpop.f32.mrb[6].mxu1 }
 0x3db   :  { %544 = vst [vmem:[#allocation12] sm:$0xff] %v539_v57  ;;  %v727_v60 = vpop.f32.mrb[7].mxu1 }
 0x3dc   :  { %916 = shalt.err (!%p913_p10)
}
 0x3dd   :  { %s917_s5 = scalar_lea.hbm %s1115_s6, 128 }
 0x3de   :  { %p918_p11 = scmp.ne.s32.totalorder %s1115_s6, %s917_s5  ;;  %p921_p12 = scmp.lt.u32.totalorder %s917_s5, %s1115_s6 }
 0x3e0   :  { %p923_p13 = pnand %p921_p12, %p918_p11 }
 0x3e2   :  { %926 = shalt.err (!%p923_p13)
}
 0x3e3   :  { %564 = dma.vmem_to_hbm [thread:$0]  %s562_s0, 128, %s1115_s6, [#allocation13]  }
 0x3e4   :  { %933 = dma.done.wait [#allocation4], 128  }
 0x3e5   :  { %934 = vsyncadd [#allocation4], 4294967168 }
 0x3e6   :  { %935 = dma.done.wait [#allocation13], 128  }
 0x3e7   :  { %936 = vsyncadd [#allocation13], 4294967168 }
 0x3e8   :  { %571 = vsyncpa [#allocation3], 1 }
 0x3e9   :  { %572 = vsyncpa [#allocation6], 1 }
 0x3ea   :  { %573 = vsyncpa [#allocation9], 1 }
 0x3eb   :  { %574 = vsyncpa [#allocation4], 1 }
 0x3ec   :  { %575 = vsyncpa [#allocation13], 1 }

</bundles_post_ra>
